<compile_context>
chip_gen: v7x
topology: tpu7x:2x2x1
jax: 0.10.0
libtpu: 0.0.40
codegen_flags: <defaults>
</compile_context>

<pallas_src>
import jax
import jax.numpy as jnp
from jax.experimental import pallas as pl
from jax.experimental.pallas import tpu as pltpu


_LANE = 128                  # TPU lane width; edge tiles are lane-aligned
_MAX_TILE_E = 2048           # upper bound on edges per grid step
_ONEHOT_BUDGET = 4 << 20     # bytes allowed for the bf16 [2N, tile_E] one-hot
_HEAD_PAD = 8                # head output columns padded 3 -> 8 (event + 2 rot)


def _round_up(v, m):
    return pl.cdiv(v, m) * m


# ----------------------------------------------------------------------------
# Prelude kernel (runs once): encoder surrogate + fused src/dst head projection
# ----------------------------------------------------------------------------
def _encoder_proj_kernel(x_t_ref, w_enc_t_ref, b_enc_t_ref, w_head_t_ref,
                         proj_ref):
    # encoder/decoder surrogate: h^T = tanh(W_enc^T @ x^T + b)     f32 [C, N]
    h_t = jnp.tanh(
        jnp.dot(w_enc_t_ref[...].astype(jnp.bfloat16),
                x_t_ref[...].astype(jnp.bfloat16),
                preferred_element_type=jnp.float32)
        + b_enc_t_ref[...])
    # fused src/dst head projections: [16, C] @ [C, N] -> [16, N], stored bf16
    # (rows 0-7 = src head, rows 8-15 = dst head; bias added in the edge kernel)
    proj_ref[...] = jnp.dot(
        w_head_t_ref[...].astype(jnp.bfloat16), h_t.astype(jnp.bfloat16),
        preferred_element_type=jnp.float32).astype(proj_ref.dtype)


# ----------------------------------------------------------------------------
# Edge kernel: fused one-hot gather matmul + head epilogue for one edge tile
# ----------------------------------------------------------------------------
def _edge_head_kernel(proj_ref, b_head_ref, src_ref, dstn_ref, out_ref):
    two_n = proj_ref.shape[1]        # 2 * number of 'joint' nodes
    tile_e = out_ref.shape[1]        # edges handled by this grid step

    # Single fused gather matmul.  One-hot over the concatenated src/dst node
    # axis: rows 0..N-1 select src-head columns, rows N..2N-1 select dst-head
    # columns (dstn = dst + N was precomputed in the wrapper).  Built directly
    # in bf16 (exact for 0/1) so the only matmul that scales with E stays on
    # the fast bf16 MXU path.  Assumes src/dst node ids lie in [0, N).
    idx = jax.lax.broadcasted_iota(jnp.int32, (two_n, tile_e), 0)
    hit = jnp.logical_or(idx == src_ref[...], idx == dstn_ref[...])
    oh = jnp.where(hit, jnp.ones((), jnp.bfloat16), jnp.zeros((), jnp.bfloat16))

    logits = jnp.dot(proj_ref[...], oh,
                     preferred_element_type=jnp.float32) + b_head_ref[...]

    # Epilogue: row 0 = raw event logit, rows 1-2 = sigmoid(.) - 0.5,
    # rows 3-7 = zero pad.  Two tiny [8, 1] masks instead of a full-tile
    # iota + nested selects.
    row = jax.lax.broadcasted_iota(jnp.int32, (out_ref.shape[0], 1), 0)
    ev_mask = (row == 0).astype(jnp.float32)
    rot_mask = jnp.logical_and(row >= 1, row < 3).astype(jnp.float32)
    out_ref[...] = logits * ev_mask + (jax.nn.sigmoid(logits) - 0.5) * rot_mask


# ----------------------------------------------------------------------------
# Wrapper mirroring regressor_classifier.forward for the 'joint' node type
# ----------------------------------------------------------------------------
def regressor_classifier_forward(x_dict, edge_index_dict, params):
    x_joint = x_dict["joint"]                                    # [N, F]
    edge_index = edge_index_dict[("joint", "connect", "joint")]  # [2, E] int32
    n, f_in = x_joint.shape
    c = params["w_enc"].shape[1]
    e = edge_index.shape[1]

    if e == 0:   # degenerate case: no joint-connect-joint edges
        return {"edge_event": jnp.zeros((0,), jnp.float32),
                "edge_rotation": jnp.zeros((0, 2), jnp.float32)}

    # ---- one-time parameter re-layout (cheap glue) ----
    # lin2 ([2C,1]) and lin1 ([2C,2]) split into src/dst halves, fused into a
    # single [C, 3] head per side (col 0 = event, cols 1-2 = rotation),
    # zero-padded to 8 columns, transposed, then stacked into one [16, C].
    w1, b1 = params["w1"], params["b1"]
    w2, b2 = params["w2"], params["b2"]
    pad = _HEAD_PAD - 3
    w_src_t = jnp.pad(jnp.concatenate([w2[:c], w1[:c]], axis=1),
                      ((0, 0), (0, pad))).T                      # [8, C]
    w_dst_t = jnp.pad(jnp.concatenate([w2[c:], w1[c:]], axis=1),
                      ((0, 0), (0, pad))).T                      # [8, C]
    w_head_t = jnp.concatenate([w_src_t, w_dst_t], axis=0)       # [16, C]
    b_head_t = jnp.pad(jnp.concatenate([b2, b1], axis=1),
                       ((0, 0), (0, pad))).T                     # [8, 1]

    x_t = x_joint.T                                              # [F, N]
    w_enc_t = params["w_enc"].T                                  # [C, F]
    b_enc_t = params["b_enc"].T                                  # [C, 1]

    const = lambda i: (0, 0)
    tiled = lambda i: (0, i)

    # ---- prelude: edge-invariant encoder + projections, computed once ----
    proj16 = pl.pallas_call(
        _encoder_proj_kernel,
        out_shape=jax.ShapeDtypeStruct((2 * _HEAD_PAD, n), jnp.bfloat16),
        grid_spec=pltpu.PrefetchScalarGridSpec(
            num_scalar_prefetch=0,
            grid=(1,),
            in_specs=[
                pl.BlockSpec((f_in, n), const),          # x^T
                pl.BlockSpec((c, f_in), const),          # W_enc^T
                pl.BlockSpec((c, 1), const),             # b_enc^T
                pl.BlockSpec((2 * _HEAD_PAD, c), const), # stacked head weights
            ],
            out_specs=pl.BlockSpec((2 * _HEAD_PAD, n), const),
        ),
        compiler_params=pltpu.CompilerParams(
            dimension_semantics=("arbitrary",)),
    )(x_t, w_enc_t, b_enc_t, w_head_t)

    # [8, 2N] bf16 resident slab: cols 0..N-1 = src-head proj, N..2N-1 = dst.
    proj_cat_t = jnp.concatenate([proj16[:_HEAD_PAD], proj16[_HEAD_PAD:]],
                                 axis=1)

    # ---- edge tiling (lane-aligned, VMEM-budgeted, >=2 steps when possible) --
    budget_cap = max(_LANE,
                     (_ONEHOT_BUDGET // max(1, 4 * n)) // _LANE * _LANE)
    two_step = _round_up(pl.cdiv(e, 2), _LANE)   # engage both v7x TCs
    tile_e = max(_LANE, min(_MAX_TILE_E, budget_cap, two_step))
    e_pad = _round_up(e, tile_e)

    src = jnp.zeros((1, e_pad), jnp.int32).at[0, :e].set(edge_index[0])
    dstn = jnp.zeros((1, e_pad), jnp.int32).at[0, :e].set(edge_index[1] + n)

    out = pl.pallas_call(
        _edge_head_kernel,
        out_shape=jax.ShapeDtypeStruct((_HEAD_PAD, e_pad), jnp.float32),
        grid_spec=pltpu.PrefetchScalarGridSpec(
            num_scalar_prefetch=0,
            grid=(e_pad // tile_e,),
            in_specs=[
                pl.BlockSpec((_HEAD_PAD, 2 * n), const),   # projection slab
                pl.BlockSpec((_HEAD_PAD, 1), const),       # head bias
                pl.BlockSpec((1, tile_e), tiled),          # src node ids
                pl.BlockSpec((1, tile_e), tiled),          # dst node ids + N
            ],
            out_specs=pl.BlockSpec((_HEAD_PAD, tile_e), tiled),
        ),
        compiler_params=pltpu.CompilerParams(
            dimension_semantics=("parallel",),             # shard edges over TCs
            vmem_limit_bytes=32 * 1024 * 1024),
    )(proj_cat_t, b_head_t, src, dstn)

    edge_event = out[0, :e]            # [E]   (matches .view(-1))
    edge_rotation = out[1:3, :e].T     # [E, 2]
    return {"edge_event": edge_event, "edge_rotation": edge_rotation}


# ----------------------------------------------------------------------------
# Demo / smoke test
# ----------------------------------------------------------------------------
if __name__ == "__main__":
    key = jax.random.PRNGKey(0)
    k0, k1, k2, k3, k4, k5, k6, k7 = jax.random.split(key, 8)

    N = 16        # number of 'joint' nodes
    F_IN = 4      # len(hyper.features['joint'])
    C = 32        # hyper.layer_size (out_channels)
    E = 300       # number of joint-connect-joint edges (spans 2 edge tiles)

    # inputs
    x_joint = jax.random.normal(k0, (N, F_IN), dtype=jnp.float32)
    edge_index = jax.random.randint(k1, (2, E), 0, N, dtype=jnp.int32)

    # deterministic parameter init
    w_enc = 0.1 * jax.random.normal(k2, (F_IN, C), dtype=jnp.float32)   # encoder surrogate
    b_enc = 0.1 * jax.random.normal(k3, (1, C), dtype=jnp.float32)
    w1 = 0.1 * jax.random.normal(k4, (2 * C, 2), dtype=jnp.float32)     # lin1 (math layout)
    b1 = 0.1 * jax.random.normal(k5, (1, 2), dtype=jnp.float32)
    w2 = 0.1 * jax.random.normal(k6, (2 * C, 1), dtype=jnp.float32)     # lin2 (math layout)
    b2 = 0.1 * jax.random.normal(k7, (1, 1), dtype=jnp.float32)

    params = {"w_enc": w_enc, "b_enc": b_enc, "w1": w1, "b1": b1,
              "w2": w2, "b2": b2}
    x_dict = {"joint": x_joint}
    edge_index_dict = {("joint", "connect", "joint"): edge_index}

    y_dict = regressor_classifier_forward(x_dict, edge_index_dict, params)
    jax.block_until_ready(y_dict)

    assert y_dict["edge_event"].shape == (E,)
    assert y_dict["edge_rotation"].shape == (E, 2)
    # edge_rotation = sigmoid(...) - 0.5  must lie in (-0.5, 0.5)
    assert bool(jnp.all(jnp.abs(y_dict["edge_rotation"]) < 0.5))

    # pure-JAX f32 reference of the same math (surrogate encoder + head);
    # tolerance covers the bf16 MXU operands / bf16 projection slab.
    h_ref = jnp.tanh(x_joint @ w_enc + b_enc)
    pair = jnp.concatenate([h_ref[edge_index[0]], h_ref[edge_index[1]]], axis=-1)
    ev_ref = (pair @ w2 + b2).reshape(-1)
    rot_ref = jax.nn.sigmoid(pair @ w1 + b1) - 0.5
    assert float(jnp.max(jnp.abs(y_dict["edge_event"] - ev_ref))) < 5e-2
    assert float(jnp.max(jnp.abs(y_dict["edge_rotation"] - rot_ref))) < 5e-2

    print("KERNEL_OK")
</pallas_src>

<mosaic_0001>
module attributes {stable_mosaic.version = 11 : i64} {
  func.func @_encoder_proj_kernel(%arg0: i32, %arg1: memref<4x16xf32, #tpu.memory_space<vmem>>, %arg2: memref<32x4xf32, #tpu.memory_space<vmem>>, %arg3: memref<32x1xf32, #tpu.memory_space<vmem>>, %arg4: memref<16x32xf32, #tpu.memory_space<vmem>>, %arg5: memref<16x16xbf16, #tpu.memory_space<vmem>>) attributes {dimension_semantics = [#tpu.dimension_semantics<arbitrary>], iteration_bounds = array<i64: 1>, scalar_prefetch = 0 : i64, scratch_operands = 0 : i64, tpu.core_type = #tpu.core_type<tc>, window_params = [{pipeline_mode = #tpu.pipeline_mode<synchronous>, transform_indices = @transform_0, window_bounds = array<i64: 4, 16>}, {pipeline_mode = #tpu.pipeline_mode<synchronous>, transform_indices = @transform_1, window_bounds = array<i64: 32, 4>}, {pipeline_mode = #tpu.pipeline_mode<synchronous>, transform_indices = @transform_2, window_bounds = array<i64: 32, 1>}, {pipeline_mode = #tpu.pipeline_mode<synchronous>, transform_indices = @transform_3, window_bounds = array<i64: 16, 32>}, {pipeline_mode = #tpu.pipeline_mode<synchronous>, transform_indices = @transform_4, window_bounds = array<i64: 16, 16>}]} {
    %c0 = arith.constant 0 : index
    %c0_0 = arith.constant 0 : index
    %0 = vector.load %arg2[%c0, %c0_0] : memref<32x4xf32, #tpu.memory_space<vmem>>, vector<32x4xf32>
    %1 = arith.truncf %0 : vector<32x4xf32> to vector<32x4xbf16>
    %c0_1 = arith.constant 0 : index
    %c0_2 = arith.constant 0 : index
    %2 = vector.load %arg1[%c0_1, %c0_2] : memref<4x16xf32, #tpu.memory_space<vmem>>, vector<4x16xf32>
    %3 = arith.truncf %2 : vector<4x16xf32> to vector<4x16xbf16>
    %cst = arith.constant dense<0.000000e+00> : vector<32x16xf32>
    %4 = tpu.matmul %1, %3, %cst {dimension_numbers = #tpu.dot_dimension_numbers<[1], [0], [0], [1], [0, 0, 1, 1], [], []>} : vector<32x4xbf16>, vector<4x16xbf16>, vector<32x16xf32> -> vector<32x16xf32>
    %c0_3 = arith.constant 0 : index
    %c0_4 = arith.constant 0 : index
    %5 = vector.load %arg3[%c0_3, %c0_4] : memref<32x1xf32, #tpu.memory_space<vmem>>, vector<32x1xf32>
    %6 = vector.broadcast %5 : vector<32x1xf32> to vector<32x16xf32>
    %7 = arith.addf %4, %6 : vector<32x16xf32>
    %8 = math.tanh %7 : vector<32x16xf32>
    %c0_5 = arith.constant 0 : index
    %c0_6 = arith.constant 0 : index
    %9 = vector.load %arg4[%c0_5, %c0_6] : memref<16x32xf32, #tpu.memory_space<vmem>>, vector<16x32xf32>
    %10 = arith.truncf %9 : vector<16x32xf32> to vector<16x32xbf16>
    %11 = arith.truncf %8 : vector<32x16xf32> to vector<32x16xbf16>
    %cst_7 = arith.constant dense<0.000000e+00> : vector<16x16xf32>
    %12 = tpu.matmul %10, %11, %cst_7 {dimension_numbers = #tpu.dot_dimension_numbers<[1], [0], [0], [1], [0, 0, 1, 1], [], []>} : vector<16x32xbf16>, vector<32x16xbf16>, vector<16x16xf32> -> vector<16x16xf32>
    %13 = arith.truncf %12 : vector<16x16xf32> to vector<16x16xbf16>
    %c0_8 = arith.constant 0 : index
    %c0_9 = arith.constant 0 : index
    %14 = vector.load %arg5[%c0_8, %c0_9] : memref<16x16xbf16, #tpu.memory_space<vmem>>, vector<16x16xbf16>
    tpu.vector_store %arg5[%c0_8, %c0_9], %13 {strides = array<i32>} : memref<16x16xbf16, #tpu.memory_space<vmem>>, vector<16x16xbf16>,
    return
  }
  func.func @transform_0(%arg0: i32) -> (i32, i32) {
    %c0_i32 = arith.constant 0 : i32
    %c0_i32_0 = arith.constant 0 : i32
    %c0_i32_1 = arith.constant 0 : i32
    return %c0_i32, %c0_i32_0 : i32, i32
  }
  func.func @transform_1(%arg0: i32) -> (i32, i32) {
    %c0_i32 = arith.constant 0 : i32
    %c0_i32_0 = arith.constant 0 : i32
    %c0_i32_1 = arith.constant 0 : i32
    return %c0_i32, %c0_i32_0 : i32, i32
  }
  func.func @transform_2(%arg0: i32) -> (i32, i32) {
    %c0_i32 = arith.constant 0 : i32
    %c0_i32_0 = arith.constant 0 : i32
    %c0_i32_1 = arith.constant 0 : i32
    return %c0_i32, %c0_i32_0 : i32, i32
  }
  func.func @transform_3(%arg0: i32) -> (i32, i32) {
    %c0_i32 = arith.constant 0 : i32
    %c0_i32_0 = arith.constant 0 : i32
    %c0_i32_1 = arith.constant 0 : i32
    return %c0_i32, %c0_i32_0 : i32, i32
  }
  func.func @transform_4(%arg0: i32) -> (i32, i32) {
    %c0_i32 = arith.constant 0 : i32
    %c0_i32_0 = arith.constant 0 : i32
    %c0_i32_1 = arith.constant 0 : i32
    return %c0_i32, %c0_i32_0 : i32, i32
  }
}

</mosaic_0001>

<bundles_post_ra>
// kernel: tpu_custom_call.1
= control target key start
LH: loop header
LB: loop body
LE: loop exit
PB: predicated region body
PF: predicated region fallthrough
CT: control target
= control target key end

     0   :  { %vm58_vm0 = vcmask 1041408   ;;  %vm51_vm1 = vcmask 31744   ;;  %v260_v8 = vmov 0   ;;  %s338_s0 = inlined_call_operand.vmem [shape: f32[4,16], index: 0, kind: input, shape index: {}]   ;;  %s339_s1 = inlined_call_operand.vmem [shape: f32[32,4], index: 1, kind: input, shape index: {}]   ;;  %s340_s2 = inlined_call_operand.vmem [shape: f32[32,1], index: 2, kind: input, shape index: {}]   ;;  %s341_s3 = inlined_call_operand.vmem [shape: f32[16,32], index: 3, kind: input, shape index: {}]   ;;  %s342_s4 = inlined_call_operand.hbm [shape: bf16[16,16], index: 4, kind: output, shape index: {}]  }
   0x1   :  { %v25_v0 = vld [vmem:[%s338_s0] sm:$0xf]  ;;  %v20_v2 = vld [vmem:[%s339_s1 + $0x8] sm:$0xff]  ;;  %v21_v5 = vld [vmem:[%s339_s1 + $0x10] sm:$0xff]  ;;  %226 = vset.pattern.permute.xlu0 %v260_v8  ;;  %227 = vset.pattern.permute.xlu1 %v260_v8 }
   0x2   :  { %v19_v1 = vld [vmem:[%s339_s1] sm:$0xff]  ;;  %v26_v3 = vpack.c.bf16 %v25_v0, %v25_v0  ;;  %v22_v6 = vld [vmem:[%s339_s1 + $0x18] sm:$0xff]  ;;  %v29_v9 = vld [vmem:[%s340_s2 + $0x10] sm:$0xff] }
   0x3   :  { %v23_v4 = vpack.c.bf16 %v20_v2, %v19_v1  ;;  %v27_v7 = vld [vmem:[%s340_s2] sm:$0xff]  ;;  %v24_v11 = vpack.c.bf16 %v22_v6, %v21_v5 }
   0x4   :  { %219 = vmatprep.subr.msk.bf16.mxu0 %vm58_vm0, %v26_v3  ;;  %v60_v10 = vsel %vm58_vm0, %v26_v3, 0 }
   0x5   :  { %207 = vmatprep.mubr.msk.bf16.mxu0 %vm51_vm1, %v23_v4 }
   0x6   :  { %9 = vsyncpa [#allocation3], 0  ;;  %206 = vmatpush3.bf16.msra.mxu0 %v60_v10  ;;  %33 = vperm.xlu0 %226, %v27_v7   ;;  %v28_v12 = vld [vmem:[%s340_s2 + $0x8] sm:$0xff]  ;;  %v30_v13 = vld [vmem:[%s340_s2 + $0x18] sm:$0xff]  ;;  %v261_v14 = vmov 0.0   ;;  %vm262_vm2 = vmmov 0  }
   0x7   :  { %43 = vperm.xlu1 %227, %v29_v9   ;;  %211 = vmatprep.subr.bf16.mxu1 %v261_v14  ;;  %v115_v33 = vld [vmem:[%s341_s3] sm:$0xff]  ;;  %v116_v34 = vld [vmem:[%s341_s3 + $0x8] sm:$0xff]  ;;  %vm120_vm3 = vcmask 261120   ;;  %s263_s8 = smov [#allocation2]   ;;  %vm173_vm4 = vcmask 125952  }
   0x8   :  { %215 = vmatprep.mubr.msk.bf16.mxu1 %vm262_vm2, %v261_v14  ;;  %v117_v35 = vpack.c.bf16 %v116_v34, %v115_v33  ;;  %s181_s9 = sshll.u32 %s263_s8, 4  ;;  %s182_s9 = int_to_ptr.vmem [resolvable:$true] %s181_s9 }
   0x9   :  { %208 = vmatmul.mubr.msk.bf16.vlgmr.msra.gmra.mrb[0].mxu0 %vm51_vm1, %v24_v11  ;;  %s236_s10 = scalar_lea.vmem %s182_s9, 128  ;;  %p241_p1 = scmp.lt.s32.totalorder %s182_s9, %s182_s9 }
   0xa   :  { %38 = vperm.xlu0 %226, %v28_v12   ;;  %p237_p0 = scmp.ne.s32.totalorder %s182_s9, %s236_s10  ;;  %p242_p2 = scmp.lt.s32.totalorder %s236_s10, %s236_s10 }
   0xb   :  { %48 = vperm.xlu1 %227, %v30_v13  }
   0xc   :  { %p243_p3 = por %p242_p2, %p241_p1 }
   0xe   :  { %p244_p4 = pnand %p243_p3, %p237_p0 }
  0x85   :  { %v34_v16 = vpop.permute.xlu0 %33 }
  0x86   :  { %v44_v15 = vpop.permute.xlu1 %43 }
  0x89   :  { %v39_v23 = vpop.permute.xlu0 %38 }
  0x8a   :  { %v49_v18 = vpop.permute.xlu1 %48 }
  0xdc   :  { %v209_v17 = vpop.f32.mrb[0].mxu0 }
  0xdd   :  { %v105_v19 = vadd.f32 %v209_v17, %v44_v15  ;;  %v96_v20 = vpop.f32.mrb[1].mxu0 }
  0xde   :  { %v97_v21 = vadd.f32 %v96_v20, %v34_v16  ;;  %v210_v22 = vpop.f32.mrb[2].mxu0 }
  0xdf   :  { %228 = vtanh.f32 %v105_v19  ;;  %v108_v24 = vadd.f32 %v210_v22, %v49_v18  ;;  %v99_v25 = vpop.f32.mrb[3].mxu0 }
  0xe0   :  { %230 = vtanh.f32 %v97_v21  ;;  %v100_v26 = vadd.f32 %v99_v25, %v39_v23 }
  0xe1   :  { %232 = vtanh.f32 %v108_v24 }
  0xe2   :  { %234 = vtanh.f32 %v100_v26 }
  0xe9   :  { %v229_v27 = vpop.eup %228 }
  0xea   :  { %v231_v28 = vpop.eup %230 }
  0xeb   :  { %v233_v29 = vpop.eup %232 }
  0xec   :  { %v235_v30 = vpop.eup %234  ;;  %v119_v31 = vpack.c.bf16 %v233_v29, %v229_v27 }
  0xed   :  { %v118_v32 = vpack.c.bf16 %v235_v30, %v231_v28 }
  0xef   :  { %212 = vmatpush3.bf16.msra.mxu1 %v118_v32 }
  0xf0   :  { %213 = vmatprep.subr.bf16.mxu1 %v261_v14 }
  0xf3   :  { %214 = vmatpush3.bf16.msra.mxu1 %v119_v31 }
  0xf6   :  { %216 = vmatmul.mubr.msk.bf16.vlgmr.msra.gmra.mrb[0].mxu1 %vm120_vm3, %v117_v35 }
 0x1c9   :  { %v158_v36 = vpop.f32.mrb[0].mxu1 }
 0x1ca   :  { %v197_v37 = vpack.c.bf16 %v158_v36, %v158_v36  ;;  %v217_v38 = vpop.f32.mrb[1].mxu1 }
 0x1cb   :  { %v161_v39 = vpop.f32.mrb[2].mxu1 }
 0x1cc   :  { %174 = vst.msk [vmem:[#allocation2] sm:$0xf] %vm173_vm4, %v197_v37  ;;  %v198_v40 = vpack.c.bf16 %v161_v39, %v161_v39  ;;  %v218_v41 = vpop.f32.mrb[3].mxu1 }
 0x1ce   :  { %175 = vst.msk [vmem:[#allocation2 + $0x4] sm:$0xf] %vm173_vm4, %v198_v40 }
 0x1cf   :  { %247 = shalt.err (!%p244_p4)
}
 0x1d0   :  { %s248_s12 = scalar_lea.hbm %s342_s4, 128 }
 0x1d1   :  { %p249_p5 = scmp.ne.s32.totalorder %s342_s4, %s248_s12  ;;  %p252_p6 = scmp.lt.u32.totalorder %s248_s12, %s342_s4 }
 0x1d3   :  { %p254_p7 = pnand %p252_p6, %p249_p5 }
 0x1d5   :  { %257 = shalt.err (!%p254_p7)
}
 0x1d6   :  { %s264_s17 = smov 64   ;;  %s265_s18 = smov 4  }
 0x1d7   :  { %187 = dma.vmem_to_hbm [thread:$0]  %s182_s9, 128, %s342_s4, [#allocation3], %s264_s17, %s264_s17, %s265_s18  }
 0x1d8   :  { %258 = dma.done.wait [#allocation3], 128  }
 0x1d9   :  { %259 = vsyncadd [#allocation3], 4294967168 }
 0x1da   :  { %191 = vsyncpa [#allocation3], 1 }

</bundles_post_ra>
